<compile_context>
chip_gen: v7x
topology: tpu7x:2x2x1
jax: 0.10.0
libtpu: 0.0.40
codegen_flags: <defaults>
</compile_context>

<pallas_src>
import functools

import jax
import jax.numpy as jnp
from jax.experimental import pallas as pl
from jax.experimental.pallas import tpu as pltpu


# ----------------------------- Pallas kernel --------------------------------

def _bottleneck_kernel(x_ref, w1_ref, b1_ref, w2_ref, b2_ref, w3_ref, b3_ref,
                       o_ref, *, H, W):
    """Fused Bottleneck forward for one batch element.

    x_ref : (1, Cin, H*W)      f32   (Cin == 4*planes, residual source)
    w1_ref: (planes, Cin)      bf16  (BN1 scale folded in)
    b1_ref: (planes, 1)        f32
    w2_ref: (planes, 9*planes) bf16  (BN2 scale folded in, im2col layout)
    b2_ref: (planes, 1)        f32
    w3_ref: (4*planes, planes) bf16  (BN3 scale folded in)
    b3_ref: (4*planes, 1)      f32
    o_ref : (1, Cin, H*W)      f32
    """
    HW = H * W
    x = x_ref[0]                                             # (Cin, HW) f32

    # ---- conv1 (1x1) + bn1 + relu ----------------------------------------
    out1 = jnp.dot(w1_ref[...], x.astype(jnp.bfloat16),
                   preferred_element_type=jnp.float32)        # (planes, HW)
    out1 = jnp.maximum(out1 + b1_ref[...], 0.0)

    # ---- conv2 (3x3, stride 1, pad 1) + bn2 + relu, in-kernel im2col ------
    planes = out1.shape[0]
    P = W + 1                               # flat halo covers |dh*W + dw| <= W+1
    zpad = jnp.zeros((planes, P), jnp.float32)
    flat_pad = jnp.concatenate([zpad, out1, zpad], axis=1)    # (planes, HW+2P)
    col = jax.lax.broadcasted_iota(jnp.int32, (1, HW), 1) % W
    not_first_col = (col != 0).astype(jnp.float32)            # kills wrap, dw=-1
    not_last_col = (col != W - 1).astype(jnp.float32)         # kills wrap, dw=+1

    taps = []
    for dh in (-1, 0, 1):
        for dw in (-1, 0, 1):
            off = dh * W + dw + P                             # static, >= 0
            tap = flat_pad[:, off:off + HW]                   # (planes, HW)
            if dw == -1:
                tap = tap * not_first_col
            elif dw == 1:
                tap = tap * not_last_col
            taps.append(tap)
    patches = jnp.concatenate(taps, axis=0)                   # (9*planes, HW)
    out2 = jnp.dot(w2_ref[...], patches.astype(jnp.bfloat16),
                   preferred_element_type=jnp.float32)        # (planes, HW)
    out2 = jnp.maximum(out2 + b2_ref[...], 0.0)

    # ---- conv3 (1x1) + bn3 + residual add + relu --------------------------
    out3 = jnp.dot(w3_ref[...], out2.astype(jnp.bfloat16),
                   preferred_element_type=jnp.float32)        # (4*planes, HW)
    out3 = out3 + b3_ref[...] + x
    o_ref[0] = jnp.maximum(out3, 0.0).astype(o_ref.dtype)


# ------------------------------ wrapper --------------------------------------

def fold_bn(gamma, beta, mean, var, eps=1e-5):
    scale = gamma / jnp.sqrt(var + eps)
    bias = beta - mean * scale
    return scale, bias


def bottleneck_forward(x_nchw, p):
    """Pallas implementation of Bottleneck.forward (stride=1, downsample=None)."""
    N, C, H, W = x_nchw.shape
    HW = H * W
    planes = p["w1"].shape[1]
    cout = 4 * planes
    assert C == cout, "downsample=None requires inplanes == planes * 4"

    s1, b1 = fold_bn(*p["bn1"])
    s2, b2 = fold_bn(*p["bn2"])
    s3, b3 = fold_bn(*p["bn3"])

    # Fold BN scale into weights, lay out as (Cout, K) row-major, cast to bf16.
    w1k = (p["w1"] * s1[None, :]).T.astype(jnp.bfloat16)               # (planes, C)
    w2k = jnp.transpose(p["w2"] * s2[None, None, None, :],
                        (3, 0, 1, 2)).reshape(planes, 9 * planes)
    w2k = w2k.astype(jnp.bfloat16)                                     # (planes, 9*planes)
    w3k = (p["w3"] * s3[None, :]).T.astype(jnp.bfloat16)               # (cout, planes)
    b1 = b1.reshape(planes, 1).astype(jnp.float32)
    b2 = b2.reshape(planes, 1).astype(jnp.float32)
    b3 = b3.reshape(cout, 1).astype(jnp.float32)

    x_flat = x_nchw.reshape(N, C, HW)          # contiguous NCHW -> free reshape

    kernel = functools.partial(_bottleneck_kernel, H=H, W=W)
    out = pl.pallas_call(
        kernel,
        out_shape=jax.ShapeDtypeStruct((N, C, HW), jnp.float32),
        grid=(N,),
        in_specs=[
            pl.BlockSpec((1, C, HW), lambda n: (n, 0, 0)),
            pl.BlockSpec((planes, C), lambda n: (0, 0)),
            pl.BlockSpec((planes, 1), lambda n: (0, 0)),
            pl.BlockSpec((planes, 9 * planes), lambda n: (0, 0)),
            pl.BlockSpec((planes, 1), lambda n: (0, 0)),
            pl.BlockSpec((cout, planes), lambda n: (0, 0)),
            pl.BlockSpec((cout, 1), lambda n: (0, 0)),
        ],
        out_specs=pl.BlockSpec((1, C, HW), lambda n: (n, 0, 0)),
        compiler_params=pltpu.CompilerParams(dimension_semantics=("parallel",)),
    )(x_flat, w1k, b1, w2k, b2, w3k, b3)
    return out.reshape(N, C, H, W)


# ------------------------------ reference ------------------------------------

def reference_forward(x_nchw, p, eps=1e-5):
    x = jnp.transpose(x_nchw, (0, 2, 3, 1))
    dn = ("NHWC", "HWIO", "NHWC")

    def bn(y, g, b, m, v):
        return (y - m) / jnp.sqrt(v + eps) * g + b

    o = jax.lax.conv_general_dilated(x, p["w1"][None, None], (1, 1), "VALID",
                                     dimension_numbers=dn)
    o = jax.nn.relu(bn(o, *p["bn1"]))
    o = jax.lax.conv_general_dilated(o, p["w2"], (1, 1), "SAME",
                                     dimension_numbers=dn)
    o = jax.nn.relu(bn(o, *p["bn2"]))
    o = jax.lax.conv_general_dilated(o, p["w3"][None, None], (1, 1), "VALID",
                                     dimension_numbers=dn)
    o = bn(o, *p["bn3"])
    o = jax.nn.relu(o + x)
    return jnp.transpose(o, (0, 3, 1, 2))


# -------------------------------- main ----------------------------------------

def make_params(key, inplanes, planes):
    ks = jax.random.split(key, 16)

    def bn_params(k, c):
        k1, k2, k3, k4 = jax.random.split(k, 4)
        gamma = jax.random.uniform(k1, (c,), jnp.float32, 0.5, 1.5)
        beta = 0.1 * jax.random.normal(k2, (c,), jnp.float32)
        mean = 0.1 * jax.random.normal(k3, (c,), jnp.float32)
        var = jax.random.uniform(k4, (c,), jnp.float32, 0.5, 1.5)
        return (gamma, beta, mean, var)

    return {
        # conv weights stored channels-last: (Cin, Cout) and (kh, kw, Cin, Cout)
        "w1": 0.1 * jax.random.normal(ks[0], (inplanes, planes), jnp.float32),
        "w2": 0.1 * jax.random.normal(ks[1], (3, 3, planes, planes), jnp.float32),
        "w3": 0.1 * jax.random.normal(ks[2], (planes, 4 * planes), jnp.float32),
        "bn1": bn_params(ks[3], planes),
        "bn2": bn_params(ks[4], planes),
        "bn3": bn_params(ks[5], 4 * planes),
    }


if __name__ == "__main__":
    # Bottleneck with downsample=None => inplanes == planes * expansion, stride=1
    N, H, W = 2, 16, 16
    planes = 4
    inplanes = planes * 4  # 16

    key = jax.random.PRNGKey(0)
    kx, kp = jax.random.split(key)
    x = jax.random.normal(kx, (N, inplanes, H, W), jnp.float32)   # NCHW like PyTorch
    params = make_params(kp, inplanes, planes)

    out = jax.jit(bottleneck_forward)(x, params)
    out = jax.block_until_ready(out)

    ref = reference_forward(x, params)
    assert out.shape == (N, planes * 4, H, W)
    # bf16 MXU operands (f32 accumulate) -> loosened tolerance vs. f32 reference.
    assert jnp.allclose(out, ref, rtol=3e-2, atol=3e-2), \
        f"max abs err {jnp.max(jnp.abs(out - ref))}"

    print("KERNEL_OK")
</pallas_src>

<mosaic_0001>
module attributes {stable_mosaic.version = 11 : i64} {
  func.func @_bottleneck_kernel(%arg0: i32, %arg1: memref<1x16x256xf32, #tpu.memory_space<vmem>>, %arg2: memref<4x16xbf16, #tpu.memory_space<vmem>>, %arg3: memref<4x1xf32, #tpu.memory_space<vmem>>, %arg4: memref<4x36xbf16, #tpu.memory_space<vmem>>, %arg5: memref<4x1xf32, #tpu.memory_space<vmem>>, %arg6: memref<16x4xbf16, #tpu.memory_space<vmem>>, %arg7: memref<16x1xf32, #tpu.memory_space<vmem>>, %arg8: memref<1x16x256xf32, #tpu.memory_space<vmem>>) attributes {dimension_semantics = [#tpu.dimension_semantics<parallel>], iteration_bounds = array<i64: 2>, scalar_prefetch = 0 : i64, scratch_operands = 0 : i64, tpu.core_type = #tpu.core_type<tc>, window_params = [{transform_indices = @transform_0, window_bounds = array<i64: 1, 16, 256>}, {pipeline_mode = #tpu.pipeline_mode<synchronous>, transform_indices = @transform_1, window_bounds = array<i64: 4, 16>}, {pipeline_mode = #tpu.pipeline_mode<synchronous>, transform_indices = @transform_2, window_bounds = array<i64: 4, 1>}, {pipeline_mode = #tpu.pipeline_mode<synchronous>, transform_indices = @transform_3, window_bounds = array<i64: 4, 36>}, {pipeline_mode = #tpu.pipeline_mode<synchronous>, transform_indices = @transform_4, window_bounds = array<i64: 4, 1>}, {pipeline_mode = #tpu.pipeline_mode<synchronous>, transform_indices = @transform_5, window_bounds = array<i64: 16, 4>}, {pipeline_mode = #tpu.pipeline_mode<synchronous>, transform_indices = @transform_6, window_bounds = array<i64: 16, 1>}, {transform_indices = @transform_7, window_bounds = array<i64: 1, 16, 256>}]} {
    %c0 = arith.constant 0 : index
    %c0_0 = arith.constant 0 : index
    %c0_1 = arith.constant 0 : index
    %0 = vector.load %arg1[%c0, %c0_0, %c0_1] : memref<1x16x256xf32, #tpu.memory_space<vmem>>, vector<1x16x256xf32>
    %1 = vector.shape_cast %0 : vector<1x16x256xf32> to vector<16x256xf32>
    %c0_2 = arith.constant 0 : index
    %c0_3 = arith.constant 0 : index
    %2 = vector.load %arg2[%c0_2, %c0_3] : memref<4x16xbf16, #tpu.memory_space<vmem>>, vector<4x16xbf16>
    %3 = arith.truncf %1 : vector<16x256xf32> to vector<16x256xbf16>
    %cst = arith.constant dense<0.000000e+00> : vector<4x256xf32>
    %4 = tpu.matmul %2, %3, %cst {dimension_numbers = #tpu.dot_dimension_numbers<[1], [0], [0], [1], [0, 0, 1, 1], [], []>} : vector<4x16xbf16>, vector<16x256xbf16>, vector<4x256xf32> -> vector<4x256xf32>
    %c0_4 = arith.constant 0 : index
    %c0_5 = arith.constant 0 : index
    %5 = vector.load %arg3[%c0_4, %c0_5] : memref<4x1xf32, #tpu.memory_space<vmem>>, vector<4x1xf32>
    %6 = vector.broadcast %5 : vector<4x1xf32> to vector<4x256xf32>
    %7 = arith.addf %4, %6 : vector<4x256xf32>
    %cst_6 = arith.constant 0.000000e+00 : f32
    %8 = vector.broadcast %cst_6 : f32 to vector<4x256xf32>
    %9 = arith.maximumf %7, %8 : vector<4x256xf32>
    %cst_7 = arith.constant 0.000000e+00 : f32
    %10 = vector.broadcast %cst_7 : f32 to vector<4x17xf32>
    %11 = tpu.concatenate %10, %9, %10 in 1 : vector<4x17xf32>, vector<4x256xf32>, vector<4x17xf32> -> vector<4x290xf32>
    %12 = tpu.iota {dimensions = array<i32: 1>} : vector<1x256xi32>
    %c16_i32 = arith.constant 16 : i32
    %c0_i32 = arith.constant 0 : i32
    %13 = arith.cmpi eq, %c16_i32, %c0_i32 : i32
    %c1_i32 = arith.constant 1 : i32
    %14 = arith.select %13, %c1_i32, %c16_i32 : i32
    %15 = vector.broadcast %14 : i32 to vector<1x256xi32>
    %16 = arith.remsi %12, %15 : vector<1x256xi32>
    %c0_i32_8 = arith.constant 0 : i32
    %17 = vector.broadcast %c0_i32_8 : i32 to vector<1x256xi32>
    %18 = arith.cmpi ne, %16, %17 : vector<1x256xi32>
    %c0_i32_9 = arith.constant 0 : i32
    %19 = vector.broadcast %c0_i32_9 : i32 to vector<1x256xi32>
    %20 = arith.cmpi slt, %16, %19 : vector<1x256xi32>
    %c0_i32_10 = arith.constant 0 : i32
    %21 = arith.cmpi slt, %14, %c0_i32_10 : i32
    %22 = vector.broadcast %21 : i1 to vector<1x256xi1>
    %23 = vector.broadcast %22 : vector<1x256xi1> to vector<1x256xi1>
    %24 = arith.xori %20, %23 : vector<1x256xi1>
    %25 = arith.andi %24, %18 : vector<1x256xi1>
    %26 = vector.broadcast %14 : i32 to vector<1x256xi32>
    %27 = arith.addi %16, %26 : vector<1x256xi32>
    %28 = arith.select %25, %27, %16 : vector<1x256xi1>, vector<1x256xi32>
    %c0_i32_11 = arith.constant 0 : i32
    %29 = vector.broadcast %c0_i32_11 : i32 to vector<1x256xi32>
    %30 = arith.cmpi ne, %28, %29 : vector<1x256xi32>
    %31 = arith.extui %30 : vector<1x256xi1> to vector<1x256xi32>
    %32 = arith.sitofp %31 : vector<1x256xi32> to vector<1x256xf32>
    %c15_i32 = arith.constant 15 : i32
    %33 = vector.broadcast %c15_i32 : i32 to vector<1x256xi32>
    %34 = arith.cmpi ne, %28, %33 : vector<1x256xi32>
    %35 = arith.extui %34 : vector<1x256xi1> to vector<1x256xi32>
    %36 = arith.sitofp %35 : vector<1x256xi32> to vector<1x256xf32>
    %37 = vector.extract_strided_slice %11 {offsets = [0, 0], sizes = [4, 256], strides = [1, 1]} : vector<4x290xf32> to vector<4x256xf32>
    %38 = vector.broadcast %32 : vector<1x256xf32> to vector<4x256xf32>
    %39 = arith.mulf %37, %38 : vector<4x256xf32>
    %40 = vector.extract_strided_slice %11 {offsets = [0, 1], sizes = [4, 256], strides = [1, 1]} : vector<4x290xf32> to vector<4x256xf32>
    %41 = vector.extract_strided_slice %11 {offsets = [0, 2], sizes = [4, 256], strides = [1, 1]} : vector<4x290xf32> to vector<4x256xf32>
    %42 = vector.broadcast %36 : vector<1x256xf32> to vector<4x256xf32>
    %43 = arith.mulf %41, %42 : vector<4x256xf32>
    %44 = vector.extract_strided_slice %11 {offsets = [0, 16], sizes = [4, 256], strides = [1, 1]} : vector<4x290xf32> to vector<4x256xf32>
    %45 = vector.broadcast %32 : vector<1x256xf32> to vector<4x256xf32>
    %46 = arith.mulf %44, %45 : vector<4x256xf32>
    %47 = vector.extract_strided_slice %11 {offsets = [0, 17], sizes = [4, 256], strides = [1, 1]} : vector<4x290xf32> to vector<4x256xf32>
    %48 = vector.extract_strided_slice %11 {offsets = [0, 18], sizes = [4, 256], strides = [1, 1]} : vector<4x290xf32> to vector<4x256xf32>
    %49 = vector.broadcast %36 : vector<1x256xf32> to vector<4x256xf32>
    %50 = arith.mulf %48, %49 : vector<4x256xf32>
    %51 = vector.extract_strided_slice %11 {offsets = [0, 32], sizes = [4, 256], strides = [1, 1]} : vector<4x290xf32> to vector<4x256xf32>
    %52 = vector.broadcast %32 : vector<1x256xf32> to vector<4x256xf32>
    %53 = arith.mulf %51, %52 : vector<4x256xf32>
    %54 = vector.extract_strided_slice %11 {offsets = [0, 33], sizes = [4, 256], strides = [1, 1]} : vector<4x290xf32> to vector<4x256xf32>
    %55 = vector.extract_strided_slice %11 {offsets = [0, 34], sizes = [4, 256], strides = [1, 1]} : vector<4x290xf32> to vector<4x256xf32>
    %56 = vector.broadcast %36 : vector<1x256xf32> to vector<4x256xf32>
    %57 = arith.mulf %55, %56 : vector<4x256xf32>
    %58 = tpu.concatenate %39, %40, %43, %46, %47, %50, %53, %54, %57 in 0 : vector<4x256xf32>, vector<4x256xf32>, vector<4x256xf32>, vector<4x256xf32>, vector<4x256xf32>, vector<4x256xf32>, vector<4x256xf32>, vector<4x256xf32>, vector<4x256xf32> -> vector<36x256xf32>
    %c0_12 = arith.constant 0 : index
    %c0_13 = arith.constant 0 : index
    %59 = vector.load %arg4[%c0_12, %c0_13] : memref<4x36xbf16, #tpu.memory_space<vmem>>, vector<4x36xbf16>
    %60 = arith.truncf %58 : vector<36x256xf32> to vector<36x256xbf16>
    %cst_14 = arith.constant dense<0.000000e+00> : vector<4x256xf32>
    %61 = tpu.matmul %59, %60, %cst_14 {dimension_numbers = #tpu.dot_dimension_numbers<[1], [0], [0], [1], [0, 0, 1, 1], [], []>} : vector<4x36xbf16>, vector<36x256xbf16>, vector<4x256xf32> -> vector<4x256xf32>
    %c0_15 = arith.constant 0 : index
    %c0_16 = arith.constant 0 : index
    %62 = vector.load %arg5[%c0_15, %c0_16] : memref<4x1xf32, #tpu.memory_space<vmem>>, vector<4x1xf32>
    %63 = vector.broadcast %62 : vector<4x1xf32> to vector<4x256xf32>
    %64 = arith.addf %61, %63 : vector<4x256xf32>
    %cst_17 = arith.constant 0.000000e+00 : f32
    %65 = vector.broadcast %cst_17 : f32 to vector<4x256xf32>
    %66 = arith.maximumf %64, %65 : vector<4x256xf32>
    %c0_18 = arith.constant 0 : index
    %c0_19 = arith.constant 0 : index
    %67 = vector.load %arg6[%c0_18, %c0_19] : memref<16x4xbf16, #tpu.memory_space<vmem>>, vector<16x4xbf16>
    %68 = arith.truncf %66 : vector<4x256xf32> to vector<4x256xbf16>
    %cst_20 = arith.constant dense<0.000000e+00> : vector<16x256xf32>
    %69 = tpu.matmul %67, %68, %cst_20 {dimension_numbers = #tpu.dot_dimension_numbers<[1], [0], [0], [1], [0, 0, 1, 1], [], []>} : vector<16x4xbf16>, vector<4x256xbf16>, vector<16x256xf32> -> vector<16x256xf32>
    %c0_21 = arith.constant 0 : index
    %c0_22 = arith.constant 0 : index
    %70 = vector.load %arg7[%c0_21, %c0_22] : memref<16x1xf32, #tpu.memory_space<vmem>>, vector<16x1xf32>
    %71 = vector.broadcast %70 : vector<16x1xf32> to vector<16x256xf32>
    %72 = arith.addf %69, %71 : vector<16x256xf32>
    %73 = arith.addf %72, %1 : vector<16x256xf32>
    %cst_23 = arith.constant 0.000000e+00 : f32
    %74 = vector.broadcast %cst_23 : f32 to vector<16x256xf32>
    %75 = arith.maximumf %73, %74 : vector<16x256xf32>
    %c0_24 = arith.constant 0 : index
    %c0_25 = arith.constant 0 : index
    %c0_26 = arith.constant 0 : index
    %76 = vector.load %arg8[%c0_24, %c0_25, %c0_26] : memref<1x16x256xf32, #tpu.memory_space<vmem>>, vector<1x16x256xf32>
    %77 = vector.shape_cast %76 : vector<1x16x256xf32> to vector<16x256xf32>
    %78 = vector.shape_cast %75 : vector<16x256xf32> to vector<1x16x256xf32>
    tpu.vector_store %arg8[%c0_24, %c0_25, %c0_26], %78 {strides = array<i32>} : memref<1x16x256xf32, #tpu.memory_space<vmem>>, vector<1x16x256xf32>,
    return
  }
  func.func @transform_0(%arg0: i32) -> (i32, i32, i32) {
    %c0_i32 = arith.constant 0 : i32
    %c0_i32_0 = arith.constant 0 : i32
    %c0_i32_1 = arith.constant 0 : i32
    return %arg0, %c0_i32, %c0_i32_0 : i32, i32, i32
  }
  func.func @transform_1(%arg0: i32) -> (i32, i32) {
    %c0_i32 = arith.constant 0 : i32
    %c0_i32_0 = arith.constant 0 : i32
    %c0_i32_1 = arith.constant 0 : i32
    return %c0_i32, %c0_i32_0 : i32, i32
  }
  func.func @transform_2(%arg0: i32) -> (i32, i32) {
    %c0_i32 = arith.constant 0 : i32
    %c0_i32_0 = arith.constant 0 : i32
    %c0_i32_1 = arith.constant 0 : i32
    return %c0_i32, %c0_i32_0 : i32, i32
  }
  func.func @transform_3(%arg0: i32) -> (i32, i32) {
    %c0_i32 = arith.constant 0 : i32
    %c0_i32_0 = arith.constant 0 : i32
    %c0_i32_1 = arith.constant 0 : i32
    return %c0_i32, %c0_i32_0 : i32, i32
  }
  func.func @transform_4(%arg0: i32) -> (i32, i32) {
    %c0_i32 = arith.constant 0 : i32
    %c0_i32_0 = arith.constant 0 : i32
    %c0_i32_1 = arith.constant 0 : i32
    return %c0_i32, %c0_i32_0 : i32, i32
  }
  func.func @transform_5(%arg0: i32) -> (i32, i32) {
    %c0_i32 = arith.constant 0 : i32
    %c0_i32_0 = arith.constant 0 : i32
    %c0_i32_1 = arith.constant 0 : i32
    return %c0_i32, %c0_i32_0 : i32, i32
  }
  func.func @transform_6(%arg0: i32) -> (i32, i32) {
    %c0_i32 = arith.constant 0 : i32
    %c0_i32_0 = arith.constant 0 : i32
    %c0_i32_1 = arith.constant 0 : i32
    return %c0_i32, %c0_i32_0 : i32, i32
  }
  func.func @transform_7(%arg0: i32) -> (i32, i32, i32) {
    %c0_i32 = arith.constant 0 : i32
    %c0_i32_0 = arith.constant 0 : i32
    %c0_i32_1 = arith.constant 0 : i32
    return %arg0, %c0_i32, %c0_i32_0 : i32, i32, i32
  }
}

</mosaic_0001>

<bundles_post_ra>
// kernel: bottleneck_forward.1
= control target key start
LH: loop header
LB: loop body
LE: loop exit
PB: predicated region body
PF: predicated region fallthrough
CT: control target
= control target key end

     0   :  { %s967_s24 = smov 0   ;;  %s1093_s0 = inlined_call_operand.vmem [shape: f32[2,16,256], index: 0, kind: input, shape index: {}]   ;;  %s1094_s1 = inlined_call_operand.vmem [shape: bf16[4,16], index: 1, kind: input, shape index: {}]   ;;  %s1095_s2 = inlined_call_operand.vmem [shape: f32[4,1], index: 2, kind: input, shape index: {}]   ;;  %s1096_s3 = inlined_call_operand.vmem [shape: bf16[4,36], index: 3, kind: input, shape index: {}]   ;;  %s1097_s4 = inlined_call_operand.vmem [shape: f32[4,1], index: 4, kind: input, shape index: {}]   ;;  %s1098_s5 = inlined_call_operand.vmem [shape: bf16[16,4], index: 5, kind: input, shape index: {}]   ;;  %s1099_s6 = inlined_call_operand.vmem [shape: f32[16,1], index: 6, kind: input, shape index: {}]   ;;  %s1100_s7 = inlined_call_operand.vmem [shape: f32[2,16,256], index: 7, kind: output, shape index: {}]  }
   0x1 LB: > { %s788_s25 = sadd.s32 4294967295, %s909_s24   ;;  %p792_p0 = scmp.ge.s32.totalorder %s909_s24, 1  ;;  %s909_s24 = sphi %s967_s24, %s17_s24  }
   0x2   : > { %p237_p1 = scmp.lt.s32.totalorder %s909_s24, 3 }
   0x4   : > { %p238_p2 = pnand %p792_p0, %p237_p1 }
   0x5   : > { %p269_p3 = scmp.lt.s32.totalorder (!%p238_p2), %s788_s25, 1  ;;  %v911_v0 = vmov (!%p238_p2), 0   ;;  %v287_v1 = vld [vmem:[%s1095_s2] sm:$0xf] (!%p238_p2)  ;;  %vm293_vm0 = vcmask (!%p238_p2), 130048   ;;  %v353_v9 = vlaneseq (!%p238_p2)  ;;  %v912_v14 = vmov (!%p238_p2), 0.0  }
   0x6   : > { %241 = sbr.rel (%p238_p2) target bundleno = 956 (0x3bc), region = 48  ;;  %329 = vmatprep.mubr.bf16.mxu0 (!%p238_p2), %v911_v0  ;;  %835 = vset.pattern.permute.xlu0 (!%p238_p2), %v911_v0  ;;  %v284_v8 = vld [vmem:[%s1094_s1] sm:$0x3] (!%p238_p2)  ;;  %s913_s11 = smov (!%p238_p2), 16   ;;  %vm346_vm5 = vcmask (!%p238_p2), 138240   ;;  %vm400_vm6 = vcmask (!%p238_p2), 15360  }
   0x7   : > { %290 = vperm.xlu0 (!%p238_p2), %835, %v287_v1   ;;  %636 = vmatprep.mubr.bf16.mxu1 (!%p238_p2), %v911_v0  ;;  %v354_v10 = vand.u32 (!%p238_p2), 127, %v353_v9  ;;  %s914_s12 = smov (!%p238_p2), 17   ;;  %s915_s13 = smov (!%p238_p2), 2   ;;  %vm437_vm7 = vcmask (!%p238_p2), 261120   ;;  %vm425_vm8 = vcmask (!%p238_p2), 146432   ;;  %vm449_vm9 = vcmask (!%p238_p2), 277504  }
   0x8   : > { %901 = vset.pattern.permute.xlu1 (!%p238_p2), %v911_v0  ;;  %s916_s14 = smov (!%p238_p2), 18   ;;  %s917_s15 = smov (!%p238_p2), 32   ;;  %vm468_vm10 = vcmask (!%p238_p2), 1039360   ;;  %vm482_vm11 = vcmask (!%p238_p2), 1031168   ;;  %vm499_vm12 = vcmask (!%p238_p2), 916480   ;;  %vm571_vm13 = vcmask (!%p238_p2), 1043456  }
   0x9   : > { %v355_v11 = vadd.s32 (!%p238_p2), 128, %v354_v10  ;;  %v360_v12 = vand.u32 (!%p238_p2), 15, %v354_v10  ;;  %s918_s16 = smov (!%p238_p2), 34   ;;  %s919_s17 = smov (!%p238_p2), 127   ;;  %vm541_vm14 = vcmask (!%p238_p2), 785408   ;;  %vm552_vm15 = vcmask (!%p238_p2), 777216  }
   0xa   : > { %s920_s18 = smov (!%p238_p2), 111   ;;  %s921_s19 = smov (!%p238_p2), 126  }
   0xb   : > { %v367_v13 = vand.u32 (!%p238_p2), 15, %v355_v11  ;;  %vm380_vm1 = vcmp.ne.s32.totalorder (!%p238_p2), %v360_v12, 0  ;;  %vm386_vm3 = vcmp.ne.s32.totalorder (!%p238_p2), %v360_v12, 15  ;;  %s922_s20 = smov (!%p238_p2), 95   ;;  %s923_s21 = smov (!%p238_p2), 96  }
   0xc   : > { %v1002_v15 = vsel (!%p238_p2), %vm380_vm1, 1.0, %v912_v14  ;;  %v800_v18 = vsel (!%p238_p2), %vm386_vm3, 1.0, %v912_v14  ;;  %s924_s22 = smov (!%p238_p2), 112   ;;  %s925_s23 = smov (!%p238_p2), 110   ;;  %vm527_vm1 = vcmask (!%p238_p2), 900096   ;;  %vm597_vm3 = vcmask (!%p238_p2), 1041408  }
   0xd   : > { %s1102_s25 = smov (!%p269_p3, %s788_s25), 1  ;;  %vm381_vm2 = vcmp.ne.s32.totalorder %v367_v13, 0  ;;  %vm387_vm4 = vcmp.ne.s32.totalorder %v367_v13, 15  ;;  %s926_s26 = smov 94  }
   0xe   : > { %s809_s28 = sshll.u32 %s1102_s25, 5  ;;  %v1004_v16 = vsel %vm381_vm2, 1.0, %v912_v14  ;;  %v801_v19 = vsel %vm387_vm4, 1.0, %v912_v14  ;;  %vm566_vm2 = vcmask 769024   ;;  %vm593_vm4 = vcmask 293888  }
   0xf   : > { %s273_s8 = scalar_lea.vmem %s1093_s0, %s809_s28  ;;  %v836_v17 = vpack.i.bf16 %v1004_v16, %v1002_v15  ;;  %v841_v20 = vpack.i.bf16 %v801_v19, %v800_v18 }
  0x10   : > { %v986_v2 = vld [vmem:[%s273_s8 + $0x8] sm:$0xff]  ;;  %v988_v3 = vld [vmem:[%s273_s8 + $0x18] sm:$0xff]  ;;  %v990_v4 = vld [vmem:[%s273_s8] sm:$0xff] }
  0x11   : > { %v286_v5 = vpack.c.bf16 %v988_v3, %v986_v2  ;;  %v994_v6 = vld [vmem:[%s273_s8 + $0x10] sm:$0xff]  ;;  %837 = vrot.lane.b32.xlu1 %v836_v17, %s913_s11 }
  0x12   : > { %v285_v7 = vpack.c.bf16 %v994_v6, %v990_v4 }
  0x13   : > { %297 = vmatprep.subr.bf16.mxu0 %v286_v5 }
  0x14   : > { %298 = vmatpush1.bf16.msra.mxu0 %v285_v7 }
  0x17   : > { %797 = vmatmul.mubr.msk.bf16.vlgmr.msra.gmra.mrb[0].mxu0 %vm293_vm0, %v284_v8 }
  0x18   : > { %710 = vmatprep.mubr.bf16.mxu0 %v911_v0 }
  0x83   : > { %v838_v30 = vpop.permute.xlu1 %837 }
  0x84   : > { %v840_v37 = vunpack.i.h.bf16 %v838_v30  ;;  %v839_v38 = vunpack.i.l.bf16 %v838_v30 }
  0x86   : > { %v291_v21 = vpop.permute.xlu0 %290  ;;  %v414_v45 = vsel %vm293_vm0, %v839_v38, %v840_v37  ;;  %vm510_vm0 = vcmask 908288  }
  0xea   : > { %v331_v22 = vpop.f32.mrb[0].mxu0 }
  0xeb   : > { %v332_v23 = vadd.f32 %v331_v22, %v291_v21  ;;  %v333_v24 = vpop.f32.mrb[1].mxu0 }
  0xec   : > { %v334_v25 = vadd.f32 %v333_v24, %v291_v21  ;;  %v335_v26 = vpop.f32.mrb[2].mxu0 }
  0xed   : > { %v338_v27 = vmax.f32 %v332_v23, 0.0  ;;  %v336_v28 = vpop.f32.mrb[3].mxu0 }
  0xee   : > { %v339_v29 = vmax.f32 %v334_v25, 0.0  ;;  %v587_v28 = vld [vmem:[%s1097_s4] sm:$0xf] }
  0xef   : > { %342 = vrot.lane.b32.xlu0 %v338_v27, %s914_s12 }
  0xf0   : > { %344 = vrot.lane.b32.xlu1 %v339_v29, %s914_s12  ;;  %v652_v29 = vld [vmem:[%s1099_s6 + $0x8] sm:$0xff] }
  0xf3   : > { %842 = vrot.lane.b32.xlu0 %v841_v20, %s915_s13 }
  0xf4   : > { %847 = vrot.lane.b32.xlu1 %v841_v20, %s916_s14 }
  0xf7   : > { %852 = vrot.lane.b32.xlu0 %v836_v17, %s917_s15 }
  0xf8   : > { %857 = vrot.lane.b32.xlu1 %v841_v20, %s918_s16 }
 0x161   : > { %v343_v31 = vpop.permute.xlu0 %342 }
 0x162   : > { %v1008_v32 = vsel %vm346_vm5, 0.0, %v343_v31  ;;  %v345_v33 = vpop.permute.xlu1 %344 }
 0x163   : > { %v1010_v34 = vsel %vm346_vm5, %v343_v31, %v345_v33  ;;  %v1012_v35 = vsel %vm346_vm5, %v345_v33, 0.0  ;;  %v459_v36 = vrot.slane %v1008_v32, 4  ;;  %v418_v0 = vmul.f32 %v839_v38, %v1008_v32 }
 0x164   : > { %v861_v39 = vpack.i.bf16 %v1012_v35, %v1010_v34  ;;  %v460_v43 = vrot.slane %v1010_v34, 4  ;;  %v461_v44 = vrot.slane %v1012_v35, 4  ;;  %v419_v56 = vmul.f32 %v414_v45, %v1010_v34 }
 0x165   : > { %462 = vrot.lane.b32.xlu1 %v459_v36, %s919_s17  ;;  %v843_v40 = vpop.permute.xlu0 %842  ;;  %v420_v57 = vmul.f32 %v840_v37, %v1012_v35  ;;  %v490_v11 = vrot.slane %v418_v0, 4  ;;  %vm668_vm5 = vcmask 31744  }
 0x166   : > { %v845_v41 = vunpack.i.h.bf16 %v843_v40  ;;  %v844_v42 = vunpack.i.l.bf16 %v843_v40  ;;  %862 = vrot.lane.b32.xlu0 %v861_v39, %s920_s18  ;;  %v848_v49 = vpop.permute.xlu1 %847  ;;  %v866_v55 = vpack.i.bf16 %v461_v44, %v460_v43  ;;  %v491_v5 = vrot.slane %v419_v56, 4 }
 0x167   : > { %v850_v58 = vunpack.i.h.bf16 %v848_v49  ;;  %v849_v59 = vunpack.i.l.bf16 %v848_v49  ;;  %v492_v7 = vrot.slane %v420_v57, 4  ;;  %v393_v49 = vmul.f32 %v1004_v16, %v1010_v34 }
 0x168   : > { %v407_v46 = vmul.f32 %v845_v41, %v1012_v35  ;;  %v401_v47 = vsel %vm400_vm6, %v844_v42, %v845_v41  ;;  %v405_v48 = vmul.f32 %v844_v42, %v1008_v32 }
 0x169   : > { %v853_v50 = vpop.permute.xlu0 %852  ;;  %v406_v51 = vmul.f32 %v401_v47, %v1010_v34  ;;  %v426_v1 = vsel %vm425_vm8, %v849_v59, %v850_v58  ;;  %v432_v9 = vmul.f32 %v850_v58, %v1012_v35  ;;  %v430_v10 = vmul.f32 %v849_v59, %v1008_v32 }
 0x16a   : > { %v855_v52 = vunpack.i.h.bf16 %v853_v50  ;;  %v854_v53 = vunpack.i.l.bf16 %v853_v50  ;;  %476 = vrot.lane.b32.xlu0 %v405_v48, %s921_s19  ;;  %v858_v8 = vpop.permute.xlu1 %857  ;;  %v431_v12 = vmul.f32 %v426_v1, %v1010_v34  ;;  %v886_v13 = vpack.i.bf16 %v492_v7, %v491_v5 }
 0x16b   : > { %v871_v54 = vpack.i.bf16 %v407_v46, %v406_v51  ;;  %v860_v14 = vunpack.i.h.bf16 %v858_v8  ;;  %v859_v17 = vunpack.i.l.bf16 %v858_v8  ;;  %v520_v18 = vrot.slane %v432_v9, 4 }
 0x16c   : > { %v444_v60 = vmul.f32 %v855_v52, %v1012_v35  ;;  %v438_v61 = vsel %vm437_vm7, %v854_v53, %v855_v52  ;;  %v518_v19 = vrot.slane %v430_v10, 4  ;;  %v519_v20 = vrot.slane %v431_v12, 4 }
 0x16d   : > { %872 = vrot.lane.b32.xlu1 %v871_v54, %s921_s19  ;;  %v443_v62 = vmul.f32 %v438_v61, %v1010_v34  ;;  %v450_v21 = vsel %vm449_vm9, %v859_v17, %v860_v14  ;;  %v442_v23 = vmul.f32 %v854_v53, %v1008_v32  ;;  %v454_v24 = vmul.f32 %v859_v17, %v1008_v32 }
 0x16e   : > { %867 = vrot.lane.b32.xlu0 %v866_v55, %s919_s17  ;;  %v891_v22 = vpack.i.bf16 %v520_v18, %v519_v20  ;;  %v455_v25 = vmul.f32 %v450_v21, %v1010_v34  ;;  %v456_v27 = vmul.f32 %v860_v14, %v1012_v35  ;;  %v392_v50 = vmul.f32 %v1002_v15, %v1008_v32  ;;  %s278_s17 = scalar_lea.vmem %s1100_s7, %s809_s28 }
 0x16f   : > { %v876_v63 = vpack.i.bf16 %v444_v60, %v443_v62 }
 0x170   : > { %v896_v26 = vpack.i.bf16 %v455_v25, %v454_v24 }
 0x171   : > { %882 = vrot.lane.b32.xlu1 %v866_v55, %s922_s20 }
 0x172   : > { %877 = vrot.lane.b32.xlu0 %v876_v63, %s923_s21 }
 0x175   : > { %493 = vrot.lane.b32.xlu1 %v490_v11, %s924_s22 }
 0x176   : > { %887 = vrot.lane.b32.xlu0 %v886_v13, %s924_s22 }
 0x179   : > { %521 = vrot.lane.b32.xlu1 %v518_v19, %s925_s23 }
 0x17a   : > { %504 = vrot.lane.b32.xlu0 %v1008_v32, %s920_s18 }
 0x17d   : > { %892 = vrot.lane.b32.xlu1 %v891_v22, %s925_s23 }
 0x17e   : > { %535 = vrot.lane.b32.xlu0 %v442_v23, %s923_s21 }
 0x181   : > { %546 = vrot.lane.b32.xlu1 %v459_v36, %s922_s20 }
 0x182   : > { %897 = vrot.lane.b32.xlu0 %v896_v26, %s926_s26 }
 0x185   : > { %564 = vrot.lane.b32.xlu1 %v456_v27, %s926_s26 }
 0x186   : > { %590 = vperm.xlu0 %835, %v587_v28  }
 0x18a   : > { %660 = vperm.xlu0 %835, %v652_v29  }
 0x1d7   : > { %v463_v31 = vpop.permute.xlu1 %462 }
 0x1d8   : > { %v863_v30 = vpop.permute.xlu0 %862 }
 0x1d9   : > { %v865_v32 = vunpack.i.h.bf16 %v863_v30  ;;  %v864_v0 = vunpack.i.l.bf16 %v863_v30 }
 0x1db   : > { %v512_v11 = vsel %vm510_vm0, %v864_v0, %v865_v32 }
 0x1dc   : > { %v477_v33 = vpop.permute.xlu0 %476 }
 0x1df   : > { %v873_v37 = vpop.permute.xlu1 %872 }
 0x1e0   : > { %v868_v36 = vpop.permute.xlu0 %867  ;;  %v875_v41 = vunpack.i.h.bf16 %v873_v37  ;;  %v874_v42 = vunpack.i.l.bf16 %v873_v37 }
 0x1e1   : > { %v870_v39 = vunpack.i.h.bf16 %v868_v36  ;;  %v869_v40 = vunpack.i.l.bf16 %v868_v36 }
 0x1e2   : > { %v484_v53 = vsel %vm482_vm11, %v874_v42, %v875_v41  ;;  %v483_v54 = vsel %vm482_vm11, %v477_v33, %v874_v42 }
 0x1e3   : > { %v883_v38 = vpop.permute.xlu1 %882  ;;  %v470_v45 = vsel %vm468_vm10, %v869_v40, %v870_v39  ;;  %v469_v46 = vsel %vm468_vm10, %v463_v31, %v869_v40  ;;  %v651_v39 = vld [vmem:[%s1099_s6] sm:$0xff] }
 0x1e4   : > { %v878_v35 = vpop.permute.xlu0 %877  ;;  %v885_v51 = vunpack.i.h.bf16 %v883_v38  ;;  %v884_v52 = vunpack.i.l.bf16 %v883_v38  ;;  %v573_v57 = vsel %vm571_vm13, %v393_v49, %v470_v45  ;;  %v572_v59 = vsel %vm571_vm13, %v392_v50, %v469_v46  ;;  %v580_v38 = vld [vmem:[%s1096_s3] sm:$0x3]  ;;  %655 = vperm.xlu1 %901, %v651_v39  }
 0x1e5   : > { %v880_v60 = vunpack.i.h.bf16 %v878_v35  ;;  %v879_v61 = vunpack.i.l.bf16 %v878_v35 }
 0x1e6   : > { %v554_v10 = vsel %vm552_vm15, %v884_v52, %v885_v51  ;;  %v902_v51 = vld [vmem:[%s1098_s5] sm:$0xff]  }
 0x1e7   : > { %v494_v43 = vpop.permute.xlu1 %493  ;;  %v543_v9 = vsel %vm541_vm14, %v879_v61, %v880_v60 }
 0x1e8   : > { %v888_v44 = vpop.permute.xlu0 %887  ;;  %v579_v18 = vsel %vm571_vm13, %v543_v9, %v554_v10 }
 0x1e9   : > { %v890_v47 = vunpack.i.h.bf16 %v888_v44  ;;  %v889_v48 = vunpack.i.l.bf16 %v888_v44 }
 0x1eb   : > { %v522_v55 = vpop.permute.xlu1 %521  ;;  %v501_v56 = vsel %vm499_vm12, %v889_v48, %v890_v47  ;;  %v500_v58 = vsel %vm499_vm12, %v494_v43, %v889_v48 }
 0x1ec   : > { %v505_v62 = vpop.permute.xlu0 %504  ;;  %v575_v63 = vsel %vm571_vm13, %v484_v53, %v501_v56  ;;  %v574_v16 = vsel %vm571_vm13, %v483_v54, %v500_v58 }
 0x1ed   : > { %v582_v34 = vpack.c.bf16 %v575_v63, %v573_v57  ;;  %v581_v15 = vpack.c.bf16 %v574_v16, %v572_v59  ;;  %v511_v19 = vsel %vm510_vm0, %v505_v62, %v864_v0 }
 0x1ef   : > { %v893_v1 = vpop.permute.xlu1 %892  ;;  %604 = vmatprep.subr.bf16.mxu1 %v582_v34 }
 0x1f0   : > { %v895_v5 = vunpack.i.h.bf16 %v893_v1  ;;  %v894_v7 = vunpack.i.l.bf16 %v893_v1  ;;  %v536_v8 = vpop.permute.xlu0 %535  ;;  %605 = vmatpush1.bf16.msra.mxu1 %v581_v15 }
 0x1f1   : > { %v542_v20 = vsel %vm541_vm14, %v536_v8, %v879_v61 }
 0x1f2   : > { %v528_v12 = vsel %vm527_vm1, %v522_v55, %v894_v7  ;;  %v529_v13 = vsel %vm527_vm1, %v894_v7, %v895_v5 }
 0x1f3   : > { %v547_v14 = vpop.permute.xlu1 %546  ;;  %v577_v17 = vsel %vm571_vm13, %v512_v11, %v529_v13  ;;  %v576_v27 = vsel %vm571_vm13, %v511_v19, %v528_v12 }
 0x1f4   : > { %v553_v21 = vsel %vm552_vm15, %v547_v14, %v884_v52  ;;  %v898_v22 = vpop.permute.xlu0 %897  ;;  %v584_v23 = vpack.c.bf16 %v579_v18, %v577_v17 }
 0x1f5   : > { %v578_v24 = vsel %vm571_vm13, %v542_v20, %v553_v21  ;;  %v900_v25 = vunpack.i.h.bf16 %v898_v22  ;;  %v899_v26 = vunpack.i.l.bf16 %v898_v22 }
 0x1f6   : > { %606 = vmatprep.subr.bf16.mxu1 %v584_v23  ;;  %v583_v28 = vpack.c.bf16 %v578_v24, %v576_v27 }
 0x1f7   : > { %v565_v29 = vpop.permute.xlu1 %564  ;;  %v567_v30 = vsel %vm566_vm2, %v899_v26, %v900_v25 }
 0x1f8   : > { %v568_v31 = vsel %vm566_vm2, %v900_v25, %v565_v29  ;;  %607 = vmatpush1.bf16.msra.mxu1 %v583_v28  ;;  %v585_v33 = vpack.c.bf16 %v567_v30, %v567_v30 }
 0x1f9   : > { %v586_v37 = vpack.c.bf16 %v568_v31, %v568_v31 }
 0x1fa   : > { %v599_v36 = vsel %vm597_vm3, %v585_v33, 0 }
 0x1fb   : > { %802 = vmatprep.subr.msk.bf16.mxu1 %vm597_vm3, %v586_v37 }
 0x1fc   : > { %609 = vmatpush1.bf16.msra.mxu1 %v599_v36 }
 0x1ff   : > { %803 = vmatmul.mubr.msk.bf16.vlgmr.msra.gmra.mrb[0].mxu1 %vm593_vm4, %v580_v38 }
 0x205   : > { %v591_v40 = vpop.permute.xlu0 %590 }
 0x209   : > { %v661_v56 = vpop.permute.xlu0 %660 }
 0x263   : > { %v656_v52 = vpop.permute.xlu1 %655 }
 0x2d2   : > { %v638_v35 = vpop.f32.mrb[0].mxu1 }
 0x2d3   : > { %v639_v41 = vadd.f32 %v638_v35, %v591_v40  ;;  %v640_v42 = vpop.f32.mrb[1].mxu1 }
 0x2d4   : > { %v641_v43 = vadd.f32 %v640_v42, %v591_v40  ;;  %v642_v44 = vpop.f32.mrb[2].mxu1 }
 0x2d5   : > { %v645_v45 = vmax.f32 %v639_v41, 0.0  ;;  %v643_v46 = vpop.f32.mrb[3].mxu1 }
 0x2d6   : > { %v646_v47 = vmax.f32 %v641_v43, 0.0 }
 0x2d7   : > { %v649_v48 = vpack.c.bf16 %v645_v45, %v645_v45 }
 0x2d8   : > { %v650_v49 = vpack.c.bf16 %v646_v47, %v646_v47 }
 0x2d9   : > { %v673_v50 = vsel %vm597_vm3, %v649_v48, 0 }
 0x2da   : > { %805 = vmatprep.subr.msk.bf16.mxu0 %vm597_vm3, %v650_v49 }
 0x2db   : > { %679 = vmatpush1.bf16.msra.mxu0 %v673_v50 }
 0x2de   : > { %806 = vmatmul.mubr.msk.bf16.vlgmr.msra.gmra.mrb[4].mxu0 %vm668_vm5, %v902_v51 }
 0x3b1   : > { %v712_v53 = vpop.f32.mrb[4].mxu0 }
 0x3b2   : > { %v714_v54 = vpop.f32.mrb[5].mxu0  ;;  %v713_v55 = vadd.f32 %v712_v53, %v656_v52 }
 0x3b3   : > { %v716_v57 = vpop.f32.mrb[6].mxu0  ;;  %v715_v58 = vadd.f32 %v714_v54, %v656_v52 }
 0x3b4   : > { %v717_v59 = vadd.f32 %v716_v57, %v661_v56  ;;  %v718_v60 = vpop.f32.mrb[7].mxu0  ;;  %v721_v61 = vadd.f32 %v713_v55, %v990_v4 }
 0x3b5   : > { %v719_v62 = vadd.f32 %v718_v60, %v661_v56  ;;  %v722_v63 = vadd.f32 %v715_v58, %v986_v2 }
 0x3b6   : > { %v723_v16 = vadd.f32 %v717_v59, %v994_v6  ;;  %v725_v34 = vmax.f32 %v721_v61, 0.0 }
 0x3b7   : > { %v724_v15 = vadd.f32 %v719_v62, %v988_v3  ;;  %v726_v32 = vmax.f32 %v722_v63, 0.0 }
 0x3b8   : > { %v727_v0 = vmax.f32 %v723_v16, 0.0  ;;  %729 = vst [vmem:[%s278_s17] sm:$0xff] %v725_v34 }
 0x3b9   : > { %v728_v1 = vmax.f32 %v724_v15, 0.0  ;;  %730 = vst [vmem:[%s278_s17 + $0x8] sm:$0xff] %v726_v32 }
 0x3ba   : > { %731 = vst [vmem:[%s278_s17 + $0x10] sm:$0xff] %v727_v0 }
 0x3bb   : > { %732 = vst [vmem:[%s278_s17 + $0x18] sm:$0xff] %v728_v1 }
 0x3bc PF: > { %s17_s24 = sadd.s32 1, %s909_s24  }
 0x3bd   : > { %p14_p4 = scmp.ge.s32.totalorder %s17_s24, 4  }
 0x3bf   :  { %16 = sbr.rel (!%p14_p4) target bundleno = 1 (0x1), region = 78 }

</bundles_post_ra>
